<compile_context>
chip_gen: v5e
topology: v5e:2x2
jax: 0.10.0
libtpu: 0.0.40
codegen_flags: <defaults>
</compile_context>

<pallas_src>
import math

import jax
import jax.numpy as jnp
from jax.experimental import pallas as pl
from jax.experimental.pallas import tpu as pltpu


# ---------------------------------------------------------------------------
# Parameter / buffer construction (matches nn.Module.__init__ exactly)
# ---------------------------------------------------------------------------
def make_positional_encoding(d_model: int, max_len: int = 5000,
                             dtype=jnp.float32) -> jnp.ndarray:
    """Builds the sinusoidal PE buffer, shape [max_len, d_model], stored in `dtype`."""
    assert d_model % 2 == 0, "d_model must be even (matches PyTorch sin/cos interleave)"
    position = jnp.arange(0, max_len, dtype=jnp.float32)[:, None]             # [L, 1]
    div_term = jnp.exp(
        jnp.arange(0, d_model, 2, dtype=jnp.float32)
        * (-math.log(10000.0) / d_model)
    )                                                                          # [D/2]
    pe = jnp.zeros((max_len, d_model), dtype=jnp.float32)
    pe = pe.at[:, 0::2].set(jnp.sin(position * div_term))
    pe = pe.at[:, 1::2].set(jnp.cos(position * div_term))
    # PyTorch stores pe as [max_len, 1, d_model] and transposes back in forward;
    # the net effect is a [1, S, D] broadcast add, so [L, D] suffices.
    return pe.astype(dtype)


# ---------------------------------------------------------------------------
# Pallas kernel: pure elementwise VPU add.
#   x_ref/o_ref : (Bb, ts, D)   pe_ref : (ts, D), broadcast over the batch block.
# The kernel is DMA-bound; the in-kernel broadcast is free (VPU slots idle).
# ---------------------------------------------------------------------------
def _pe_add_kernel(x_ref, pe_ref, o_ref):
    o_ref[...] = x_ref[...] + pe_ref[...][None, :, :]


_DEFAULT_TILE_BYTES = 4 << 20    # ~4 MiB per x/out buffer (6 live buffers ~ 24 MiB)
_VMEM_LIMIT_BYTES = 40 << 20     # explicit scoped-VMEM limit: > v5e's 16 MiB default,
                                 # safely below v7x's 64 MiB physical VMEM.


def positional_encoding_forward(x: jnp.ndarray, pe: jnp.ndarray, *,
                                tile_bytes: int = _DEFAULT_TILE_BYTES,
                                donate_x: bool = False) -> jnp.ndarray:
    """x: [B, S, D], pe: [max_len, D] -> [B, S, D]. Eval-mode forward."""
    B, S, D = x.shape
    if pe.dtype != x.dtype:
        # Prefer constructing pe in x.dtype (make_positional_encoding(dtype=...));
        # this cast is a fallback so the kernel streams PE at x.dtype width.
        pe = pe.astype(x.dtype)
    itemsize = jnp.dtype(x.dtype).itemsize
    sub = max(8, 32 // itemsize)          # sublane multiple: 8 f32, 16 bf16, 32 int8/fp8

    # --- choose (Bb, ts): largest tile <= tile_bytes per x/out buffer ---------
    max_rows = max(1, tile_bytes // (D * itemsize))
    if max_rows >= S:
        ts = S                                                    # full sequence
        bb = min(B, max(1, tile_bytes // max(1, S * D * itemsize)))  # fold batches
    else:
        bb = 1
        ts = (max_rows // sub) * sub                              # sublane-aligned seq tile
        if ts == 0:                                               # pathological huge D
            ts = min(S, sub)

    # --- PE input: pass the full table (no wrapper slice) when layout-safe ----
    # Block (ts, D) on [max_len, D] needs ts % sublane == 0 (or full extent).
    if ts % sub == 0 or ts == pe.shape[0]:
        pe_in = pe
    else:
        pe_in = pe[:S, :]   # rare fallback (e.g. S not sublane-aligned and ts == S)

    grid = (pl.cdiv(S, ts), pl.cdiv(B, bb))   # batch innermost -> PE block stays resident

    extra_kwargs = {}
    if donate_x:
        # Only when the caller no longer needs x: alias it to the output buffer.
        extra_kwargs["input_output_aliases"] = {0: 0}

    return pl.pallas_call(
        _pe_add_kernel,
        out_shape=jax.ShapeDtypeStruct((B, S, D), x.dtype),
        grid_spec=pltpu.PrefetchScalarGridSpec(
            num_scalar_prefetch=0,
            grid=grid,
            in_specs=[
                pl.BlockSpec((bb, ts, D), lambda s, b: (b, s, 0)),
                # PE block index is independent of b -> no re-DMA per batch step.
                pl.BlockSpec((ts, D), lambda s, b: (s, 0)),
            ],
            out_specs=pl.BlockSpec((bb, ts, D), lambda s, b: (b, s, 0)),
        ),
        compiler_params=pltpu.CompilerParams(
            dimension_semantics=("parallel", "parallel"),
            vmem_limit_bytes=_VMEM_LIMIT_BYTES,
        ),
        cost_estimate=pl.CostEstimate(
            flops=B * S * D,
            transcendentals=0,
            bytes_accessed=(2 * B * S * D + S * D) * itemsize,
        ),
        **extra_kwargs,
    )(x, pe_in)


# ---------------------------------------------------------------------------
# Pure-JAX reference for correctness checking
# ---------------------------------------------------------------------------
def positional_encoding_ref(x: jnp.ndarray, pe: jnp.ndarray) -> jnp.ndarray:
    S = x.shape[1]
    return x + pe[:S, :].astype(x.dtype)[None, :, :]


if __name__ == "__main__":
    MAX_LEN = 5000
    key = jax.random.PRNGKey(0)
    k1, k2, k3, k4 = jax.random.split(key, 4)

    # Test 1: module demo shape (small D, full-D block, batches folded into one step).
    B, S, D = 2, 8, 32
    x1 = jax.random.normal(k1, (B, S, D), dtype=jnp.float32)
    pe1 = make_positional_encoding(D, MAX_LEN)
    out1 = jax.block_until_ready(positional_encoding_forward(x1, pe1))
    ref1 = positional_encoding_ref(x1, pe1)
    assert out1.shape == (B, S, D) and out1.dtype == x1.dtype
    assert jnp.allclose(out1, ref1, atol=1e-6, rtol=1e-6), "mismatch (D=32)"

    # Test 2: lane-dense d_model.
    B, S, D = 2, 16, 128
    x2 = jax.random.normal(k2, (B, S, D), dtype=jnp.float32)
    pe2 = make_positional_encoding(D, MAX_LEN)
    out2 = jax.block_until_ready(positional_encoding_forward(x2, pe2))
    ref2 = positional_encoding_ref(x2, pe2)
    assert jnp.allclose(out2, ref2, atol=1e-6, rtol=1e-6), "mismatch (D=128)"

    # Test 3: bf16 PE stream + sequence length not a sublane multiple (PE-slice fallback).
    B, S, D = 1, 36, 64
    x3 = jax.random.normal(k3, (B, S, D), dtype=jnp.bfloat16)
    pe3 = make_positional_encoding(D, MAX_LEN, dtype=jnp.bfloat16)
    out3 = jax.block_until_ready(positional_encoding_forward(x3, pe3))
    ref3 = positional_encoding_ref(x3, pe3)
    assert out3.dtype == jnp.bfloat16
    assert jnp.allclose(out3.astype(jnp.float32), ref3.astype(jnp.float32),
                        atol=2e-2, rtol=2e-2), "mismatch (bf16)"

    # Test 4: force the sequence-tiled path with a ragged last block
    # (tile_bytes override only to exercise multi-step pipelining at small shapes).
    B, S, D = 2, 72, 128
    x4 = jax.random.normal(k4, (B, S, D), dtype=jnp.float32)
    pe4 = make_positional_encoding(D, MAX_LEN)
    out4 = jax.block_until_ready(
        positional_encoding_forward(x4, pe4, tile_bytes=16 * 1024))
    ref4 = positional_encoding_ref(x4, pe4)
    assert jnp.allclose(out4, ref4, atol=1e-6, rtol=1e-6), "mismatch (tiled seq)"

    print("KERNEL_OK")
</pallas_src>

<mosaic_0001>
module attributes {stable_mosaic.version = 11 : i64} {
  func.func @_pe_add_kernel(%arg0: i32, %arg1: i32, %arg2: memref<2x8x32xf32, #tpu.memory_space<vmem>>, %arg3: memref<8x32xf32, #tpu.memory_space<vmem>>, %arg4: memref<2x8x32xf32, #tpu.memory_space<vmem>>) attributes {dimension_semantics = [#tpu.dimension_semantics<parallel>, #tpu.dimension_semantics<parallel>], iteration_bounds = array<i64: 1, 1>, scalar_prefetch = 0 : i64, scratch_operands = 0 : i64, tpu.core_type = #tpu.core_type<tc>, window_params = [{transform_indices = @transform_0, window_bounds = array<i64: 2, 8, 32>}, {transform_indices = @transform_1, window_bounds = array<i64: 8, 32>}, {transform_indices = @transform_2, window_bounds = array<i64: 2, 8, 32>}]} {
    %c0 = arith.constant 0 : index
    %c0_0 = arith.constant 0 : index
    %c0_1 = arith.constant 0 : index
    %0 = vector.load %arg2[%c0, %c0_0, %c0_1] : memref<2x8x32xf32, #tpu.memory_space<vmem>>, vector<2x8x32xf32>
    %c0_2 = arith.constant 0 : index
    %c0_3 = arith.constant 0 : index
    %1 = vector.load %arg3[%c0_2, %c0_3] : memref<8x32xf32, #tpu.memory_space<vmem>>, vector<8x32xf32>
    %2 = vector.shape_cast %1 : vector<8x32xf32> to vector<1x8x32xf32>
    %3 = vector.broadcast %2 : vector<1x8x32xf32> to vector<2x8x32xf32>
    %4 = arith.addf %0, %3 : vector<2x8x32xf32>
    %c0_4 = arith.constant 0 : index
    %c0_5 = arith.constant 0 : index
    %c0_6 = arith.constant 0 : index
    %5 = vector.load %arg4[%c0_4, %c0_5, %c0_6] : memref<2x8x32xf32, #tpu.memory_space<vmem>>, vector<2x8x32xf32>
    tpu.vector_store %arg4[%c0_4, %c0_5, %c0_6], %4 {strides = array<i32>} : memref<2x8x32xf32, #tpu.memory_space<vmem>>, vector<2x8x32xf32>,
    return
  }
  func.func @transform_0(%arg0: i32, %arg1: i32) -> (i32, i32, i32) {
    %c0_i32 = arith.constant 0 : i32
    %c0_i32_0 = arith.constant 0 : i32
    return %arg1, %arg0, %c0_i32 : i32, i32, i32
  }
  func.func @transform_1(%arg0: i32, %arg1: i32) -> (i32, i32) {
    %c0_i32 = arith.constant 0 : i32
    %c0_i32_0 = arith.constant 0 : i32
    return %arg0, %c0_i32 : i32, i32
  }
  func.func @transform_2(%arg0: i32, %arg1: i32) -> (i32, i32, i32) {
    %c0_i32 = arith.constant 0 : i32
    %c0_i32_0 = arith.constant 0 : i32
    return %arg1, %arg0, %c0_i32 : i32, i32, i32
  }
}

</mosaic_0001>

<bundles_post_ra>
// kernel: tpu_custom_call.1
= control target key start
LH: loop header
LB: loop body
LE: loop exit
PB: predicated region body
PF: predicated region fallthrough
CT: control target
= control target key end

     0   :  { %vm17_vm0 = vcmask 261120   ;;  %s97_s0 = inlined_call_operand.vmem [shape: f32[2,8,32], index: 0, kind: input, shape index: {}]   ;;  %s98_s1 = inlined_call_operand.vmem [shape: f32[5000,32], index: 1, kind: input, shape index: {}]   ;;  %s99_s2 = inlined_call_operand.hbm [shape: f32[2,8,32], index: 2, kind: output, shape index: {}]  }
   0x1   :  { %v12_v0 = vld [vmem:[%s97_s0] sm:$0xff]  ;;  %v13_v2 = vld [vmem:[%s97_s0 + $0x8] sm:$0xff]  ;;  %s26_s17 = sshll.u32 %s99_s2, 4  ;;  %s27_s17 = int_to_ptr.hbm [resolvable:$true] %s26_s17 }
   0x2   :  { %v14_v1 = vld [vmem:[%s98_s1] sm:$0xff] }
   0x3   :  { %v15_v3 = vadd.f32 %v14_v1, %v12_v0  ;;  %v16_v4 = vadd.f32 %v14_v1, %v13_v2 }
   0x4   :  { %7 = vsyncpa [#allocation3], 0  ;;  %s67_s18 = smov [#allocation2]   ;;  %s68_s20 = smov 128  }
   0x5   :  { %s24_s19 = sshll.u32 %s67_s18, 4  ;;  %18 = vst.msk [vmem:[#allocation2] sm:$0xff] %vm17_vm0, %v15_v3  ;;  %s69_s1 = smov 8   ;;  %s25_s19 = int_to_ptr.vmem [resolvable:$true] %s24_s19 }
   0x6   :  { %19 = vst.msk [vmem:[#allocation2 + $0x8] sm:$0xff] %vm17_vm0, %v16_v4 }
   0x7   :  { %32 = dma.vmem_to_hbm [thread:$0]  %s25_s19, 256, %s27_s17, [#allocation3], %s68_s20, %s68_s20, %s69_s1  }
   0x8   :  { %65 = dma.done.wait [#allocation3], 256  }
   0x9   :  { %66 = vsyncadd [#allocation3], 4294967040 }
   0xa   :  { %37 = vsyncpa [#allocation3], 1 }

</bundles_post_ra>
